<compile_context>
chip_gen: v6e
topology: v6e:2x2x1
jax: 0.10.0
libtpu: 0.0.40
codegen_flags: <defaults>
</compile_context>

<pallas_src>
import functools

import jax
import jax.numpy as jnp
from jax.experimental import pallas as pl
from jax.experimental.pallas import tpu as pltpu


# ------------------------------ shared helpers ------------------------------ #
def _apply_act(y, activation):
    if activation == "relu":
        return jnp.maximum(y, 0.0)
    if activation == "relu6":
        return jnp.minimum(jnp.maximum(y, 0.0), 6.0)
    if activation == "silu":
        return y * (1.0 / (1.0 + jnp.exp(-y)))
    raise ValueError(f"unknown activation {activation}")


# ------------------------------ Pallas kernel ------------------------------ #
def _resnext_block_kernel(*refs, H, W, activation, has_shortcut):
    """One grid step = one image, channel-major (C, H*W); all stays in VMEM."""
    if has_shortcut:
        (x_ref, cm_ref, w1_ref, b1_ref, w2_ref, b2_ref, w3_ref, b3_ref,
         wsc_ref, o_ref) = refs
    else:
        (x_ref, cm_ref, w1_ref, b1_ref, w2_ref, b2_ref, w3_ref, b3_ref,
         o_ref) = refs
        wsc_ref = None

    P = H * W
    bw = w1_ref.shape[0]

    x_f32 = x_ref[...]                          # (Cin, P) f32 (identity residual path)
    x_b16 = x_f32.astype(jnp.bfloat16)

    # ---- conv1 (1x1) + folded BN1 + act: (bw, Cin) @ (Cin, P) ---------------
    h1 = jnp.dot(w1_ref[...], x_b16, preferred_element_type=jnp.float32) + b1_ref[...]
    h1 = _apply_act(h1, activation).astype(jnp.bfloat16)

    # ---- conv2 (3x3 grouped, pad=1) + folded BN2: 9 accumulated matmuls -----
    # Zero-pad the pixel/lane axis by W+1 on each side so every (dh, dw) tap is a
    # static, in-bounds lane slice; out-of-image rows read zeros, and the two
    # column-wrap cases (dw = +-1) are removed by the precomputed edge masks.
    zpad = jnp.zeros((bw, W + 1), jnp.bfloat16)
    h1w = jnp.concatenate([zpad, h1, zpad], axis=1)       # (bw, P + 2W + 2)
    mask_l = cm_ref[0:1, :]       # 1 where dest col w >= 1     (taps with dw = -1)
    mask_r = cm_ref[1:2, :]       # 1 where dest col w <= W-2   (taps with dw = +1)

    acc = jnp.zeros((bw, P), jnp.float32)
    tap = 0
    for dh in (-1, 0, 1):
        for dw in (-1, 0, 1):
            start = (W + 1) + dh * W + dw
            src = h1w[:, start:start + P]                 # (bw, P) lane shift
            if dw == -1:
                src = src * mask_l
            elif dw == 1:
                src = src * mask_r
            acc = acc + jnp.dot(w2_ref[tap], src,
                                preferred_element_type=jnp.float32)
            tap += 1
    h2 = (acc + b2_ref[...]).astype(jnp.bfloat16)

    # ---- conv3 (1x1) + folded BN3, plus shortcut ----------------------------
    y = jnp.dot(w3_ref[...], h2, preferred_element_type=jnp.float32) + b3_ref[...]
    if has_shortcut:
        y = y + jnp.dot(wsc_ref[...], x_b16, preferred_element_type=jnp.float32)
    else:
        y = y + x_f32                                     # identity residual in f32
    # TODO(synk): Dropout2d with drop_rate > 0 (training mode) not implemented;
    # the module uses drop_rate=0.0 => Identity.
    o_ref[...] = _apply_act(y, activation).astype(o_ref.dtype)


# ------------------------------ wrapper (JAX) ------------------------------ #
def resnext_block_forward(x_nchw, p, out_dtype=jnp.bfloat16):
    """Pallas implementation of ResNeXtBlock.forward (inference-mode BN)."""
    N, Cin, H, W = x_nchw.shape
    stride = p["stride"]
    bw = p["bottleneck_width"]
    Cout = p["w3"].shape[1]
    P = H * W

    # Free reshape only: NCHW -> (N, Cin, H*W).  Padding / bf16 cast happen in VMEM.
    x_flat = x_nchw.reshape(N, Cin, P)

    # Fold BN scales into the conv weights (f32 fold, bf16 cast); biases stay f32.
    # Channel-major kernel => weights stored (out, in).
    w1 = (p["w1"] * p["s1"][None, :]).T.astype(jnp.bfloat16)                 # (bw, Cin)
    b1 = p["b1"].reshape(bw, 1).astype(jnp.float32)
    w2 = jnp.transpose(p["w2dense"] * p["s2"][None, None, None, :],
                       (0, 1, 3, 2)).reshape(9, bw, bw).astype(jnp.bfloat16)  # (9,out,in)
    b2 = p["b2"].reshape(bw, 1).astype(jnp.float32)
    w3 = (p["w3"] * p["s3"][None, :]).T.astype(jnp.bfloat16)                 # (Cout, bw)
    if p["has_shortcut"]:
        b3 = (p["b3"] + p["sc_bias"]).reshape(Cout, 1).astype(jnp.float32)
        wsc = (p["wsc"] * p["sc_scale"][None, :]).T.astype(jnp.bfloat16)     # (Cout, Cin)
    else:
        b3 = p["b3"].reshape(Cout, 1).astype(jnp.float32)
        wsc = None

    # Grid-invariant column-edge masks for the dw = +-1 taps (precomputed here so
    # the kernel does no iota / integer-divide work).
    wpos = jnp.arange(P, dtype=jnp.int32) % W
    colmask = jnp.stack([(wpos >= 1), (wpos <= W - 2)]).astype(jnp.bfloat16)  # (2, P)

    flops = int(2 * N * P * (bw * Cin + 9 * bw * bw + Cout * bw
                             + (Cout * Cin if p["has_shortcut"] else 0)))
    transcendentals = int(N * P * (bw + Cout)) if p["activation"] == "silu" else 0
    out_itemsize = jnp.dtype(out_dtype).itemsize
    bytes_accessed = int(x_flat.size * 4 + N * Cout * P * out_itemsize
                         + (w1.size + w2.size + w3.size + colmask.size
                            + (wsc.size if wsc is not None else 0)) * 2
                         + (b1.size + b2.size + b3.size) * 4)

    kernel = functools.partial(_resnext_block_kernel, H=H, W=W,
                               activation=p["activation"],
                               has_shortcut=p["has_shortcut"])

    inv2 = lambda n: (0, 0)        # grid-invariant blocks: fetched once, revisited
    inv3 = lambda n: (0, 0, 0)
    in_specs = [
        pl.BlockSpec((None, Cin, P), lambda n: (n, 0, 0)),   # x, per image
        pl.BlockSpec((2, P), inv2),                          # column-edge masks
        pl.BlockSpec((bw, Cin), inv2),                       # w1 (folded)
        pl.BlockSpec((bw, 1), inv2),                         # b1
        pl.BlockSpec((9, bw, bw), inv3),                     # w2 per-tap (folded)
        pl.BlockSpec((bw, 1), inv2),                         # b2
        pl.BlockSpec((Cout, bw), inv2),                      # w3 (folded)
        pl.BlockSpec((Cout, 1), inv2),                       # b3 (+ shortcut bias)
    ]
    inputs = [x_flat, colmask, w1, b1, w2, b2, w3, b3]
    if p["has_shortcut"]:
        in_specs.append(pl.BlockSpec((Cout, Cin), inv2))     # shortcut 1x1 (folded)
        inputs.append(wsc)

    out_flat = pl.pallas_call(
        kernel,
        out_shape=jax.ShapeDtypeStruct((N, Cout, P), out_dtype),
        grid=(N,),
        in_specs=in_specs,
        out_specs=pl.BlockSpec((None, Cout, P), lambda n: (n, 0, 0)),
        compiler_params=pltpu.CompilerParams(
            dimension_semantics=("parallel",)),               # N=2 feeds v7x's 2 TCs
        cost_estimate=pl.CostEstimate(flops=flops, transcendentals=transcendentals,
                                      bytes_accessed=bytes_accessed),
    )(*inputs)

    out = out_flat.reshape(N, Cout, H, W)      # free reshape: already NCHW order
    if stride != 1:
        # conv3/shortcut/activation are pointwise, so the strided block equals the
        # full-resolution result subsampled at the strided positions.
        # TODO(synk): stride>1 still does stride**2 extra work; natively strided
        # tap/output indexing inside the kernel would avoid it.
        out = out[:, :, ::stride, ::stride]
    return out


# ----------------------------- parameter setup ----------------------------- #
def init_params(key, in_channels, out_channels, stride=1, cardinality=4,
                base_width=4, pruning_rate=1.0, activation="relu"):
    reduction = 4
    bw = int(in_channels // reduction * cardinality * base_width / cardinality)
    bw = int(bw * pruning_rate)
    bw = max(bw // cardinality * cardinality, cardinality)
    bw = (bw + 7) // 8 * 8
    cpg = bw // cardinality
    eps = 1e-5

    keys = iter(jax.random.split(key, 32))

    def bn_fold(c):
        gamma = 1.0 + 0.1 * jax.random.normal(next(keys), (c,), jnp.float32)
        beta = 0.1 * jax.random.normal(next(keys), (c,), jnp.float32)
        mean = 0.1 * jax.random.normal(next(keys), (c,), jnp.float32)
        var = 0.5 + jax.random.uniform(next(keys), (c,), jnp.float32)
        s = gamma / jnp.sqrt(var + eps)
        b = beta - mean * s
        return s, b

    p = {"stride": stride, "activation": activation, "cardinality": cardinality,
         "cpg": cpg, "bottleneck_width": bw}

    # conv1: 1x1 in_channels -> bw  (stored (Cin, bw))
    p["w1"] = 0.1 * jax.random.normal(next(keys), (in_channels, bw), jnp.float32)
    p["s1"], p["b1"] = bn_fold(bw)

    # conv2: 3x3 grouped (groups=cardinality); per-group weights plus the dense
    # block-diagonal (3,3,bw,bw) [kh,kw,in,out] equivalent used by the kernel.
    # TODO(synk): for large cardinality a per-group contraction would avoid the
    # zero blocks; at these widths the dense block-diagonal weight is negligible.
    wg = 0.1 * jax.random.normal(next(keys), (cardinality, 3, 3, cpg, cpg), jnp.float32)
    p["wg"] = wg
    w_dense = jnp.zeros((3, 3, bw, bw), jnp.float32)
    for g in range(cardinality):
        w_dense = w_dense.at[:, :, g * cpg:(g + 1) * cpg,
                             g * cpg:(g + 1) * cpg].set(wg[g])
    p["w2dense"] = w_dense
    p["s2"], p["b2"] = bn_fold(bw)

    # conv3: 1x1 bw -> out_channels (stored (bw, Cout))
    p["w3"] = 0.1 * jax.random.normal(next(keys), (bw, out_channels), jnp.float32)
    p["s3"], p["b3"] = bn_fold(out_channels)

    p["has_shortcut"] = (stride != 1) or (in_channels != out_channels)
    if p["has_shortcut"]:
        p["wsc"] = 0.1 * jax.random.normal(next(keys), (in_channels, out_channels),
                                           jnp.float32)
        p["sc_scale"], p["sc_bias"] = bn_fold(out_channels)
    return p


# ------------------------- pure-JAX reference check ------------------------ #
def reference_forward(x_nchw, p):
    dn = ("NHWC", "HWIO", "NHWC")
    stride = p["stride"]
    act = lambda y: _apply_act(y, p["activation"])
    prec = jax.lax.Precision.HIGHEST

    def conv(lhs, rhs, s, padding, groups=1):
        return jax.lax.conv_general_dilated(
            lhs, rhs, (s, s), padding, dimension_numbers=dn,
            feature_group_count=groups, precision=prec)

    x = jnp.transpose(x_nchw, (0, 2, 3, 1))
    if p["has_shortcut"]:
        rsc = p["wsc"].reshape(1, 1, *p["wsc"].shape)
        ident = conv(x, rsc, stride, "VALID") * p["sc_scale"] + p["sc_bias"]
    else:
        ident = x
    r1 = p["w1"].reshape(1, 1, *p["w1"].shape)
    out = act(conv(x, r1, 1, "VALID") * p["s1"] + p["b1"])
    r2 = jnp.transpose(p["wg"], (1, 2, 3, 0, 4)).reshape(3, 3, p["cpg"], -1)
    out = conv(out, r2, stride, ((1, 1), (1, 1)),
               groups=p["cardinality"]) * p["s2"] + p["b2"]
    r3 = p["w3"].reshape(1, 1, *p["w3"].shape)
    out = conv(out, r3, 1, "VALID") * p["s3"] + p["b3"]
    # Dropout2d(drop_rate=0.0) == Identity.
    out = act(out + ident)
    return jnp.transpose(out, (0, 3, 1, 2))


# ----------------------------------- main ----------------------------------- #
if __name__ == "__main__":
    key = jax.random.PRNGKey(0)
    N, H, W = 2, 16, 16

    configs = [
        # projection shortcut (Cin != Cout), ReLU
        dict(in_channels=16, out_channels=32, stride=1, cardinality=4,
             base_width=4, activation="relu"),
        # identity shortcut (Cin == Cout), SiLU
        dict(in_channels=32, out_channels=32, stride=1, cardinality=4,
             base_width=4, activation="silu"),
    ]

    for cfg in configs:
        k_x, k_p, key = jax.random.split(key, 3)
        x = jax.random.normal(k_x, (N, cfg["in_channels"], H, W), jnp.float32)
        params = init_params(k_p, pruning_rate=1.0, **cfg)

        y = jax.block_until_ready(resnext_block_forward(x, params))
        y_ref = jax.block_until_ready(reference_forward(x, params))

        assert y.shape == y_ref.shape == (N, cfg["out_channels"], H, W), (y.shape, y_ref.shape)
        y32 = y.astype(jnp.float32)
        max_err = float(jnp.max(jnp.abs(y32 - y_ref)))
        # bf16 MXU inputs / bf16 output with f32 accumulation -> loosened tolerance.
        assert jnp.allclose(y32, y_ref, rtol=5e-2, atol=5e-2), max_err

    print("KERNEL_OK")
</pallas_src>

<mosaic_0001>
module attributes {stable_mosaic.version = 11 : i64} {
  func.func @_resnext_block_kernel(%arg0: i32, %arg1: memref<1x16x256xf32, #tpu.memory_space<vmem>>, %arg2: memref<2x256xbf16, #tpu.memory_space<vmem>>, %arg3: memref<16x16xbf16, #tpu.memory_space<vmem>>, %arg4: memref<16x1xf32, #tpu.memory_space<vmem>>, %arg5: memref<9x16x16xbf16, #tpu.memory_space<vmem>>, %arg6: memref<16x1xf32, #tpu.memory_space<vmem>>, %arg7: memref<32x16xbf16, #tpu.memory_space<vmem>>, %arg8: memref<32x1xf32, #tpu.memory_space<vmem>>, %arg9: memref<32x16xbf16, #tpu.memory_space<vmem>>, %arg10: memref<1x32x256xbf16, #tpu.memory_space<vmem>>) attributes {dimension_semantics = [#tpu.dimension_semantics<parallel>], iteration_bounds = array<i64: 2>, scalar_prefetch = 0 : i64, scratch_operands = 0 : i64, tpu.core_type = #tpu.core_type<tc>, window_params = [{transform_indices = @transform_0, window_bounds = array<i64: 1, 16, 256>}, {pipeline_mode = #tpu.pipeline_mode<synchronous>, transform_indices = @transform_1, window_bounds = array<i64: 2, 256>}, {pipeline_mode = #tpu.pipeline_mode<synchronous>, transform_indices = @transform_2, window_bounds = array<i64: 16, 16>}, {pipeline_mode = #tpu.pipeline_mode<synchronous>, transform_indices = @transform_3, window_bounds = array<i64: 16, 1>}, {pipeline_mode = #tpu.pipeline_mode<synchronous>, transform_indices = @transform_4, window_bounds = array<i64: 9, 16, 16>}, {pipeline_mode = #tpu.pipeline_mode<synchronous>, transform_indices = @transform_5, window_bounds = array<i64: 16, 1>}, {pipeline_mode = #tpu.pipeline_mode<synchronous>, transform_indices = @transform_6, window_bounds = array<i64: 32, 16>}, {pipeline_mode = #tpu.pipeline_mode<synchronous>, transform_indices = @transform_7, window_bounds = array<i64: 32, 1>}, {pipeline_mode = #tpu.pipeline_mode<synchronous>, transform_indices = @transform_8, window_bounds = array<i64: 32, 16>}, {transform_indices = @transform_9, window_bounds = array<i64: 1, 32, 256>}]} {
    %c0 = arith.constant 0 : index
    %c0_0 = arith.constant 0 : index
    %c0_1 = arith.constant 0 : index
    %0 = vector.load %arg1[%c0, %c0_0, %c0_1] : memref<1x16x256xf32, #tpu.memory_space<vmem>>, vector<1x16x256xf32>
    %1 = vector.shape_cast %0 : vector<1x16x256xf32> to vector<16x256xf32>
    %2 = arith.truncf %1 : vector<16x256xf32> to vector<16x256xbf16>
    %c0_2 = arith.constant 0 : index
    %c0_3 = arith.constant 0 : index
    %3 = vector.load %arg3[%c0_2, %c0_3] : memref<16x16xbf16, #tpu.memory_space<vmem>>, vector<16x16xbf16>
    %cst = arith.constant dense<0.000000e+00> : vector<16x256xf32>
    %4 = tpu.matmul %3, %2, %cst {dimension_numbers = #tpu.dot_dimension_numbers<[1], [0], [0], [1], [0, 0, 1, 1], [], []>} : vector<16x16xbf16>, vector<16x256xbf16>, vector<16x256xf32> -> vector<16x256xf32>
    %c0_4 = arith.constant 0 : index
    %c0_5 = arith.constant 0 : index
    %5 = vector.load %arg4[%c0_4, %c0_5] : memref<16x1xf32, #tpu.memory_space<vmem>>, vector<16x1xf32>
    %6 = vector.broadcast %5 : vector<16x1xf32> to vector<16x256xf32>
    %7 = arith.addf %4, %6 : vector<16x256xf32>
    %cst_6 = arith.constant 0.000000e+00 : f32
    %8 = vector.broadcast %cst_6 : f32 to vector<16x256xf32>
    %9 = arith.maximumf %7, %8 : vector<16x256xf32>
    %10 = arith.truncf %9 : vector<16x256xf32> to vector<16x256xbf16>
    %cst_7 = arith.constant 0.000000e+00 : bf16
    %11 = vector.broadcast %cst_7 : bf16 to vector<16x17xbf16>
    %12 = tpu.concatenate %11, %10, %11 in 1 : vector<16x17xbf16>, vector<16x256xbf16>, vector<16x17xbf16> -> vector<16x290xbf16>
    %c0_8 = arith.constant 0 : index
    %c0_9 = arith.constant 0 : index
    %13 = vector.load %arg2[%c0_8, %c0_9] : memref<2x256xbf16, #tpu.memory_space<vmem>>, vector<1x256xbf16>
    %c1 = arith.constant 1 : index
    %c0_10 = arith.constant 0 : index
    %14 = vector.load %arg2[%c1, %c0_10] : memref<2x256xbf16, #tpu.memory_space<vmem>>, vector<1x256xbf16>
    %cst_11 = arith.constant 0.000000e+00 : f32
    %15 = vector.broadcast %cst_11 : f32 to vector<16x256xf32>
    %16 = vector.extract_strided_slice %12 {offsets = [0, 0], sizes = [16, 256], strides = [1, 1]} : vector<16x290xbf16> to vector<16x256xbf16>
    %17 = vector.broadcast %13 : vector<1x256xbf16> to vector<16x256xbf16>
    %18 = arith.mulf %16, %17 : vector<16x256xbf16>
    %c0_12 = arith.constant 0 : index
    %c0_13 = arith.constant 0 : index
    %c0_14 = arith.constant 0 : index
    %19 = vector.load %arg5[%c0_12, %c0_13, %c0_14] : memref<9x16x16xbf16, #tpu.memory_space<vmem>>, vector<1x16x16xbf16>
    %20 = vector.shape_cast %19 : vector<1x16x16xbf16> to vector<16x16xbf16>
    %cst_15 = arith.constant dense<0.000000e+00> : vector<16x256xf32>
    %21 = tpu.matmul %20, %18, %cst_15 {dimension_numbers = #tpu.dot_dimension_numbers<[1], [0], [0], [1], [0, 0, 1, 1], [], []>} : vector<16x16xbf16>, vector<16x256xbf16>, vector<16x256xf32> -> vector<16x256xf32>
    %22 = arith.addf %15, %21 : vector<16x256xf32>
    %23 = vector.extract_strided_slice %12 {offsets = [0, 1], sizes = [16, 256], strides = [1, 1]} : vector<16x290xbf16> to vector<16x256xbf16>
    %c1_16 = arith.constant 1 : index
    %c0_17 = arith.constant 0 : index
    %c0_18 = arith.constant 0 : index
    %24 = vector.load %arg5[%c1_16, %c0_17, %c0_18] : memref<9x16x16xbf16, #tpu.memory_space<vmem>>, vector<1x16x16xbf16>
    %25 = vector.shape_cast %24 : vector<1x16x16xbf16> to vector<16x16xbf16>
    %cst_19 = arith.constant dense<0.000000e+00> : vector<16x256xf32>
    %26 = tpu.matmul %25, %23, %cst_19 {dimension_numbers = #tpu.dot_dimension_numbers<[1], [0], [0], [1], [0, 0, 1, 1], [], []>} : vector<16x16xbf16>, vector<16x256xbf16>, vector<16x256xf32> -> vector<16x256xf32>
    %27 = arith.addf %22, %26 : vector<16x256xf32>
    %28 = vector.extract_strided_slice %12 {offsets = [0, 2], sizes = [16, 256], strides = [1, 1]} : vector<16x290xbf16> to vector<16x256xbf16>
    %29 = vector.broadcast %14 : vector<1x256xbf16> to vector<16x256xbf16>
    %30 = arith.mulf %28, %29 : vector<16x256xbf16>
    %c2 = arith.constant 2 : index
    %c0_20 = arith.constant 0 : index
    %c0_21 = arith.constant 0 : index
    %31 = vector.load %arg5[%c2, %c0_20, %c0_21] : memref<9x16x16xbf16, #tpu.memory_space<vmem>>, vector<1x16x16xbf16>
    %32 = vector.shape_cast %31 : vector<1x16x16xbf16> to vector<16x16xbf16>
    %cst_22 = arith.constant dense<0.000000e+00> : vector<16x256xf32>
    %33 = tpu.matmul %32, %30, %cst_22 {dimension_numbers = #tpu.dot_dimension_numbers<[1], [0], [0], [1], [0, 0, 1, 1], [], []>} : vector<16x16xbf16>, vector<16x256xbf16>, vector<16x256xf32> -> vector<16x256xf32>
    %34 = arith.addf %27, %33 : vector<16x256xf32>
    %35 = vector.extract_strided_slice %12 {offsets = [0, 16], sizes = [16, 256], strides = [1, 1]} : vector<16x290xbf16> to vector<16x256xbf16>
    %36 = vector.broadcast %13 : vector<1x256xbf16> to vector<16x256xbf16>
    %37 = arith.mulf %35, %36 : vector<16x256xbf16>
    %c3 = arith.constant 3 : index
    %c0_23 = arith.constant 0 : index
    %c0_24 = arith.constant 0 : index
    %38 = vector.load %arg5[%c3, %c0_23, %c0_24] : memref<9x16x16xbf16, #tpu.memory_space<vmem>>, vector<1x16x16xbf16>
    %39 = vector.shape_cast %38 : vector<1x16x16xbf16> to vector<16x16xbf16>
    %cst_25 = arith.constant dense<0.000000e+00> : vector<16x256xf32>
    %40 = tpu.matmul %39, %37, %cst_25 {dimension_numbers = #tpu.dot_dimension_numbers<[1], [0], [0], [1], [0, 0, 1, 1], [], []>} : vector<16x16xbf16>, vector<16x256xbf16>, vector<16x256xf32> -> vector<16x256xf32>
    %41 = arith.addf %34, %40 : vector<16x256xf32>
    %42 = vector.extract_strided_slice %12 {offsets = [0, 17], sizes = [16, 256], strides = [1, 1]} : vector<16x290xbf16> to vector<16x256xbf16>
    %c4 = arith.constant 4 : index
    %c0_26 = arith.constant 0 : index
    %c0_27 = arith.constant 0 : index
    %43 = vector.load %arg5[%c4, %c0_26, %c0_27] : memref<9x16x16xbf16, #tpu.memory_space<vmem>>, vector<1x16x16xbf16>
    %44 = vector.shape_cast %43 : vector<1x16x16xbf16> to vector<16x16xbf16>
    %cst_28 = arith.constant dense<0.000000e+00> : vector<16x256xf32>
    %45 = tpu.matmul %44, %42, %cst_28 {dimension_numbers = #tpu.dot_dimension_numbers<[1], [0], [0], [1], [0, 0, 1, 1], [], []>} : vector<16x16xbf16>, vector<16x256xbf16>, vector<16x256xf32> -> vector<16x256xf32>
    %46 = arith.addf %41, %45 : vector<16x256xf32>
    %47 = vector.extract_strided_slice %12 {offsets = [0, 18], sizes = [16, 256], strides = [1, 1]} : vector<16x290xbf16> to vector<16x256xbf16>
    %48 = vector.broadcast %14 : vector<1x256xbf16> to vector<16x256xbf16>
    %49 = arith.mulf %47, %48 : vector<16x256xbf16>
    %c5 = arith.constant 5 : index
    %c0_29 = arith.constant 0 : index
    %c0_30 = arith.constant 0 : index
    %50 = vector.load %arg5[%c5, %c0_29, %c0_30] : memref<9x16x16xbf16, #tpu.memory_space<vmem>>, vector<1x16x16xbf16>
    %51 = vector.shape_cast %50 : vector<1x16x16xbf16> to vector<16x16xbf16>
    %cst_31 = arith.constant dense<0.000000e+00> : vector<16x256xf32>
    %52 = tpu.matmul %51, %49, %cst_31 {dimension_numbers = #tpu.dot_dimension_numbers<[1], [0], [0], [1], [0, 0, 1, 1], [], []>} : vector<16x16xbf16>, vector<16x256xbf16>, vector<16x256xf32> -> vector<16x256xf32>
    %53 = arith.addf %46, %52 : vector<16x256xf32>
    %54 = vector.extract_strided_slice %12 {offsets = [0, 32], sizes = [16, 256], strides = [1, 1]} : vector<16x290xbf16> to vector<16x256xbf16>
    %55 = vector.broadcast %13 : vector<1x256xbf16> to vector<16x256xbf16>
    %56 = arith.mulf %54, %55 : vector<16x256xbf16>
    %c6 = arith.constant 6 : index
    %c0_32 = arith.constant 0 : index
    %c0_33 = arith.constant 0 : index
    %57 = vector.load %arg5[%c6, %c0_32, %c0_33] : memref<9x16x16xbf16, #tpu.memory_space<vmem>>, vector<1x16x16xbf16>
    %58 = vector.shape_cast %57 : vector<1x16x16xbf16> to vector<16x16xbf16>
    %cst_34 = arith.constant dense<0.000000e+00> : vector<16x256xf32>
    %59 = tpu.matmul %58, %56, %cst_34 {dimension_numbers = #tpu.dot_dimension_numbers<[1], [0], [0], [1], [0, 0, 1, 1], [], []>} : vector<16x16xbf16>, vector<16x256xbf16>, vector<16x256xf32> -> vector<16x256xf32>
    %60 = arith.addf %53, %59 : vector<16x256xf32>
    %61 = vector.extract_strided_slice %12 {offsets = [0, 33], sizes = [16, 256], strides = [1, 1]} : vector<16x290xbf16> to vector<16x256xbf16>
    %c7 = arith.constant 7 : index
    %c0_35 = arith.constant 0 : index
    %c0_36 = arith.constant 0 : index
    %62 = vector.load %arg5[%c7, %c0_35, %c0_36] : memref<9x16x16xbf16, #tpu.memory_space<vmem>>, vector<1x16x16xbf16>
    %63 = vector.shape_cast %62 : vector<1x16x16xbf16> to vector<16x16xbf16>
    %cst_37 = arith.constant dense<0.000000e+00> : vector<16x256xf32>
    %64 = tpu.matmul %63, %61, %cst_37 {dimension_numbers = #tpu.dot_dimension_numbers<[1], [0], [0], [1], [0, 0, 1, 1], [], []>} : vector<16x16xbf16>, vector<16x256xbf16>, vector<16x256xf32> -> vector<16x256xf32>
    %65 = arith.addf %60, %64 : vector<16x256xf32>
    %66 = vector.extract_strided_slice %12 {offsets = [0, 34], sizes = [16, 256], strides = [1, 1]} : vector<16x290xbf16> to vector<16x256xbf16>
    %67 = vector.broadcast %14 : vector<1x256xbf16> to vector<16x256xbf16>
    %68 = arith.mulf %66, %67 : vector<16x256xbf16>
    %c8 = arith.constant 8 : index
    %c0_38 = arith.constant 0 : index
    %c0_39 = arith.constant 0 : index
    %69 = vector.load %arg5[%c8, %c0_38, %c0_39] : memref<9x16x16xbf16, #tpu.memory_space<vmem>>, vector<1x16x16xbf16>
    %70 = vector.shape_cast %69 : vector<1x16x16xbf16> to vector<16x16xbf16>
    %cst_40 = arith.constant dense<0.000000e+00> : vector<16x256xf32>
    %71 = tpu.matmul %70, %68, %cst_40 {dimension_numbers = #tpu.dot_dimension_numbers<[1], [0], [0], [1], [0, 0, 1, 1], [], []>} : vector<16x16xbf16>, vector<16x256xbf16>, vector<16x256xf32> -> vector<16x256xf32>
    %72 = arith.addf %65, %71 : vector<16x256xf32>
    %c0_41 = arith.constant 0 : index
    %c0_42 = arith.constant 0 : index
    %73 = vector.load %arg6[%c0_41, %c0_42] : memref<16x1xf32, #tpu.memory_space<vmem>>, vector<16x1xf32>
    %74 = vector.broadcast %73 : vector<16x1xf32> to vector<16x256xf32>
    %75 = arith.addf %72, %74 : vector<16x256xf32>
    %76 = arith.truncf %75 : vector<16x256xf32> to vector<16x256xbf16>
    %c0_43 = arith.constant 0 : index
    %c0_44 = arith.constant 0 : index
    %77 = vector.load %arg7[%c0_43, %c0_44] : memref<32x16xbf16, #tpu.memory_space<vmem>>, vector<32x16xbf16>
    %cst_45 = arith.constant dense<0.000000e+00> : vector<32x256xf32>
    %78 = tpu.matmul %77, %76, %cst_45 {dimension_numbers = #tpu.dot_dimension_numbers<[1], [0], [0], [1], [0, 0, 1, 1], [], []>} : vector<32x16xbf16>, vector<16x256xbf16>, vector<32x256xf32> -> vector<32x256xf32>
    %c0_46 = arith.constant 0 : index
    %c0_47 = arith.constant 0 : index
    %79 = vector.load %arg8[%c0_46, %c0_47] : memref<32x1xf32, #tpu.memory_space<vmem>>, vector<32x1xf32>
    %80 = vector.broadcast %79 : vector<32x1xf32> to vector<32x256xf32>
    %81 = arith.addf %78, %80 : vector<32x256xf32>
    %c0_48 = arith.constant 0 : index
    %c0_49 = arith.constant 0 : index
    %82 = vector.load %arg9[%c0_48, %c0_49] : memref<32x16xbf16, #tpu.memory_space<vmem>>, vector<32x16xbf16>
    %cst_50 = arith.constant dense<0.000000e+00> : vector<32x256xf32>
    %83 = tpu.matmul %82, %2, %cst_50 {dimension_numbers = #tpu.dot_dimension_numbers<[1], [0], [0], [1], [0, 0, 1, 1], [], []>} : vector<32x16xbf16>, vector<16x256xbf16>, vector<32x256xf32> -> vector<32x256xf32>
    %84 = arith.addf %81, %83 : vector<32x256xf32>
    %cst_51 = arith.constant 0.000000e+00 : f32
    %85 = vector.broadcast %cst_51 : f32 to vector<32x256xf32>
    %86 = arith.maximumf %84, %85 : vector<32x256xf32>
    %87 = arith.truncf %86 : vector<32x256xf32> to vector<32x256xbf16>
    %c0_52 = arith.constant 0 : index
    %c0_53 = arith.constant 0 : index
    %c0_54 = arith.constant 0 : index
    %88 = vector.load %arg10[%c0_52, %c0_53, %c0_54] : memref<1x32x256xbf16, #tpu.memory_space<vmem>>, vector<1x32x256xbf16>
    %89 = vector.shape_cast %88 : vector<1x32x256xbf16> to vector<32x256xbf16>
    %90 = vector.shape_cast %87 : vector<32x256xbf16> to vector<1x32x256xbf16>
    tpu.vector_store %arg10[%c0_52, %c0_53, %c0_54], %90 {strides = array<i32>} : memref<1x32x256xbf16, #tpu.memory_space<vmem>>, vector<1x32x256xbf16>,
    return
  }
  func.func @transform_0(%arg0: i32) -> (i32, i32, i32) {
    %c0_i32 = arith.constant 0 : i32
    %c0_i32_0 = arith.constant 0 : i32
    %c0_i32_1 = arith.constant 0 : i32
    return %arg0, %c0_i32, %c0_i32_0 : i32, i32, i32
  }
  func.func @transform_1(%arg0: i32) -> (i32, i32) {
    %c0_i32 = arith.constant 0 : i32
    %c0_i32_0 = arith.constant 0 : i32
    %c0_i32_1 = arith.constant 0 : i32
    return %c0_i32, %c0_i32_0 : i32, i32
  }
  func.func @transform_2(%arg0: i32) -> (i32, i32) {
    %c0_i32 = arith.constant 0 : i32
    %c0_i32_0 = arith.constant 0 : i32
    %c0_i32_1 = arith.constant 0 : i32
    return %c0_i32, %c0_i32_0 : i32, i32
  }
  func.func @transform_3(%arg0: i32) -> (i32, i32) {
    %c0_i32 = arith.constant 0 : i32
    %c0_i32_0 = arith.constant 0 : i32
    %c0_i32_1 = arith.constant 0 : i32
    return %c0_i32, %c0_i32_0 : i32, i32
  }
  func.func @transform_4(%arg0: i32) -> (i32, i32, i32) {
    %c0_i32 = arith.constant 0 : i32
    %c0_i32_0 = arith.constant 0 : i32
    %c0_i32_1 = arith.constant 0 : i32
    %c0_i32_2 = arith.constant 0 : i32
    return %c0_i32, %c0_i32_0, %c0_i32_1 : i32, i32, i32
  }
  func.func @transform_5(%arg0: i32) -> (i32, i32) {
    %c0_i32 = arith.constant 0 : i32
    %c0_i32_0 = arith.constant 0 : i32
    %c0_i32_1 = arith.constant 0 : i32
    return %c0_i32, %c0_i32_0 : i32, i32
  }
  func.func @transform_6(%arg0: i32) -> (i32, i32) {
    %c0_i32 = arith.constant 0 : i32
    %c0_i32_0 = arith.constant 0 : i32
    %c0_i32_1 = arith.constant 0 : i32
    return %c0_i32, %c0_i32_0 : i32, i32
  }
  func.func @transform_7(%arg0: i32) -> (i32, i32) {
    %c0_i32 = arith.constant 0 : i32
    %c0_i32_0 = arith.constant 0 : i32
    %c0_i32_1 = arith.constant 0 : i32
    return %c0_i32, %c0_i32_0 : i32, i32
  }
  func.func @transform_8(%arg0: i32) -> (i32, i32) {
    %c0_i32 = arith.constant 0 : i32
    %c0_i32_0 = arith.constant 0 : i32
    %c0_i32_1 = arith.constant 0 : i32
    return %c0_i32, %c0_i32_0 : i32, i32
  }
  func.func @transform_9(%arg0: i32) -> (i32, i32, i32) {
    %c0_i32 = arith.constant 0 : i32
    %c0_i32_0 = arith.constant 0 : i32
    %c0_i32_1 = arith.constant 0 : i32
    return %arg0, %c0_i32, %c0_i32_0 : i32, i32, i32
  }
}

</mosaic_0001>

<bundles_post_ra>
// kernel: tpu_custom_call.1
= control target key start
LH: loop header
LB: loop body
LE: loop exit
PB: predicated region body
PF: predicated region fallthrough
CT: control target
= control target key end

     0   :  { %14 = vsyncpa [#allocation3], 0  ;;  %s2129_s0 = inlined_call_operand.hbm [shape: f32[2,16,256], index: 0, kind: input, shape index: {}]   ;;  %s2130_s1 = inlined_call_operand.vmem [shape: bf16[2,256], index: 1, kind: input, shape index: {}]   ;;  %s2131_s2 = inlined_call_operand.vmem [shape: bf16[16,16], index: 2, kind: input, shape index: {}]   ;;  %s2132_s3 = inlined_call_operand.vmem [shape: f32[16,1], index: 3, kind: input, shape index: {}]   ;;  %s2133_s4 = inlined_call_operand.vmem [shape: bf16[9,16,16], index: 4, kind: input, shape index: {}]   ;;  %s2134_s5 = inlined_call_operand.vmem [shape: f32[16,1], index: 5, kind: input, shape index: {}]   ;;  %s2135_s6 = inlined_call_operand.vmem [shape: bf16[32,16], index: 6, kind: input, shape index: {}]   ;;  %s2136_s7 = inlined_call_operand.vmem [shape: f32[32,1], index: 7, kind: input, shape index: {}]   ;;  %s2137_s8 = inlined_call_operand.vmem [shape: bf16[32,16], index: 8, kind: input, shape index: {}]   ;;  %s2138_s9 = inlined_call_operand.hbm [shape: bf16[2,32,256], index: 9, kind: output, shape index: {}]  }
   0x1   :  { %16 = vsyncpa [#allocation3 + $0x1], 0 }
   0x2   :  { %17 = vsyncpa [#allocation4], 0 }
   0x3   :  { %19 = vsyncpa [#allocation4 + $0x1], 0  ;;  %s1819_s30 = smov 0   ;;  %s1821_s10 = smov 0  }
   0x4   :  { %s1823_s11 = smov 0   ;;  %s1825_s12 = smov 0  }
   0x5 LB: > { %2142 = sst [smem:[#allocation8_spill]] %s1741_s11  ;;  %s1840_s13 = sadd.s32 4294967295, %s1745_s12   ;;  %s1745_s12 = sphi %s1825_s12, %s2157_s12   ;;  %s1741_s11 = sphi %s1823_s11, %s2154_s11   ;;  %s1737_s10 = sphi %s1821_s10, %s2156_s10   ;;  %s1733_s30 = sphi %s1819_s30, %s2155_s30  }
   0x6   : > { %s1502_s14 = sadd.s32 4294967294, %s1745_s12   ;;  %s1844_s15 = sadd.s32 1, %s1745_s12  }
   0x7   : > { %s32_s16 = sadd.s32 1, %s1741_s11  ;;  %s29_s17 = ssub.s32 %s1745_s12, %s1844_s15 }
   0x8   : > { %p39_p0 = scmp.ne.s32.totalorder %s1741_s11, %s1737_s10  ;;  %p30_p1 = scmp.eq.s32.totalorder %s29_s17, 0 }
   0x9   : > { %p40_p2 = scmp.eq.s32.totalorder %s1745_s12, 0  ;;  %p45_p3 = scmp.ne.s32.totalorder %s1737_s10, %s1733_s30 }
   0xa   : > { %p46_p4 = scmp.eq.s32.totalorder %s1840_s13, 0  ;;  %p237_p7 = scmp.eq.s32.totalorder %s1840_s13, 1 }
   0xb   : > { %s1856_s18 = scalar_select %p30_p1, %s1741_s11, %s32_s16  }
   0xc   : > { %p1858_p5 = por %p40_p2, %p39_p0  ;;  %p1862_p6 = por %p46_p4, %p45_p3 }
   0xd   : > { %2143 = sst [smem:[#allocation9_spill]] %s1856_s18  ;;  %p243_p8 = scmp.eq.s32.totalorder %s1502_s14, 1 }
   0xe   : > { %s2145_s20 = scalar_select %p1862_p6, 1, 0 }
   0xf   : > { %p1583_p10 = scmp.lt.s32.totalorder %s1745_s12, 2  ;;  %p1869_p11 = por %p237_p7, %p39_p0 }
  0x10   : > { %p1873_p12 = por %p243_p8, %p45_p3  ;;  %s287_s23 = sand.u32 1, %s1741_s11  }
  0x11   : > { %s2146_s21 = scalar_select %p1869_p11, 1, 0 }
  0x12   : > { %s2147_s22 = scalar_select %p1873_p12, 1, 0 }
  0x13   : > { %s1565_s24 = sshll.u32 %s1745_s12, 9  ;;  %s1505_s25 = sshll.u32 %s287_s23, 5 }
  0x14   : > { %s1882_s28 = scalar_lea.hbm %s2129_s0, %s1565_s24  ;;  %s291_s29 = scalar_lea.vmem [#allocation2], %s1505_s25 }
  0x15   : > { %s298_s14 = sshll.u32 %s291_s29, 4  ;;  %p1886_p13 = pnand %p1583_p10, %p1858_p5  ;;  %s1890_s14 = int_to_ptr.vmem [resolvable:$true] %s298_s14 }
  0x16   : > { %s1892_s17 = scalar_lea.sflag [#allocation3], %s287_s23  ;;  %s1653_s18 = scalar_lea.hbm %s1882_s28, 512 }
  0x17   : > { %p1654_p0 = scmp.ne.s32.totalorder %s1882_s28, %s1653_s18  ;;  %p1655_p1 = pneg %p1886_p13 }
  0x18   : > { %s1658_s25 = scalar_lea.hbm %s2129_s0, 1024  ;;  %p1659_p4 = scmp.lt.s32.totalorder %s1882_s28, %s2129_s0 }
  0x19   : > { %p1656_p2 = pnand %p1655_p1, %p1654_p0  ;;  %p1660_p5 = scmp.lt.s32.totalorder %s1658_s25, %s1653_s18 }
  0x1b   : > { %p1657_p3 = pneg %p1656_p2  ;;  %p1661_p7 = por %p1660_p5, %p1659_p4 }
  0x1d   : > { %p1662_p8 = pnand %p1661_p7, %p1657_p3 }
  0x1f   : > { %1665 = shalt.err (!%p1662_p8)
}
  0x20   : > { %s1666_s23 = scalar_lea.vmem %s1890_s14, 512  ;;  %s1747_s29 = smov [#allocation2]  }
  0x21   : > { %p1667_p10 = scmp.ne.s32.totalorder %s1890_s14, %s1666_s23  ;;  %s1671_s11 = sshll.u32 %s1747_s29, 4  ;;  %s1672_s11 = int_to_ptr.vmem [resolvable:$false] %s1671_s11 }
  0x22   : > { %s1673_s24 = scalar_lea.vmem %s1672_s11, 1024  ;;  %p1674_p2 = scmp.lt.s32.totalorder %s1890_s14, %s1672_s11 }
  0x23   : > { %p1669_p9 = pnand %p1667_p10, %p1655_p1  ;;  %p1675_p12 = scmp.lt.s32.totalorder %s1673_s24, %s1666_s23 }
  0x25   : > { %p1670_p0 = pneg %p1669_p9  ;;  %p1676_p11 = por %p1675_p12, %p1674_p2 }
  0x27   : > { %p1677_p6 = pnand %p1676_p11, %p1670_p0 }
  0x29   : > { %1680 = shalt.err (!%p1677_p6)
}
  0x2a   : > { %s1748_s18 = smov 256   ;;  %s1749_s26 = smov 16  }
  0x2b   : > { %1578 = dma.hbm_to_vmem [thread:$0]  (!%p1886_p13), %s1882_s28, 512, %s1890_s14, %s1892_s17, %s1748_s18, %s1748_s18, %s1749_s26  }
  0x2c   : > { %p1508_p9 = scmp.ge.s32.totalorder %s1745_s12, 1  ;;  %p306_p1 = scmp.lt.s32.totalorder %s1745_s12, 3 }
  0x2e   : > { %p307_p3 = pnand %p1508_p9, %p306_p1 }
  0x2f   : > { %s1916_s11 = sand.u32 (!%p307_p3), 1, %s1737_s10   ;;  %p2149_p6 = scmp.ne.s32.totalorder (!%p307_p3), %s2145_s20, 0 }
  0x30   : > { %310 = sbr.rel (%p307_p3) target bundleno = 982 (0x3d6), region = 56  ;;  %s1509_s25 = sshll.u32 (!%p307_p3), %s1916_s11, 5 }
  0x31   : > { %s313_s19 = scalar_lea.sflag (!%p307_p3), [#allocation3], %s1916_s11  ;;  %s316_s27 = scalar_lea.vmem (!%p307_p3), [#allocation2], %s1509_s25 }
  0x35   : > { %1724 = dma.done.wait (%p2149_p6), %s313_s19, 512  }
  0x36   : > { %1726 = vsyncadd (%p2149_p6), %s313_s19, 4294966784  ;;  %v460_v0 = vlaneseq  ;;  %v1750_v1 = vmov 0   ;;  %v1751_v2 = vmov 1966171168   ;;  %v353_v6 = vld [vmem:[%s316_s27 + $0x8] sm:$0xff]  ;;  %v355_v7 = vld [vmem:[%s316_s27 + $0x18] sm:$0xff] }
  0x37   : > { %413 = vmatprep.mubr.bf16.mxu0 %v1750_v1  ;;  %1637 = vset.pattern.permute.xlu0 %v1750_v1  ;;  %v458_v3 = vunpack.c.l.s4 %v1751_v2  ;;  %v352_v8 = vld [vmem:[%s316_s27] sm:$0xff]  ;;  %v1930_v10 = vpack.c.bf16 %v355_v7, %v353_v6  ;;  %v354_v11 = vld [vmem:[%s316_s27 + $0x10] sm:$0xff]  ;;  %vm377_vm0 = vcmask 130048   ;;  %v361_v15 = vld [vmem:[%s2132_s3 + $0x8] sm:$0xff]  ;;  %s1752_s18 = smov 2   ;;  %s1753_s26 = smov 16  }
  0x38   : > { %545 = vmatprep.mubr.bf16.mxu1 %v1750_v1  ;;  %1638 = vset.pattern.permute.xlu1 %v1750_v1  ;;  %v461_v5 = vshrl.u32 %v460_v0, 7  ;;  %v1932_v12 = vpack.c.bf16 %v354_v11, %v352_v8  ;;  %v1639_v13 = vld [vmem:[%s2131_s2] sm:$0xff]   ;;  %s1754_s19 = smov 18   ;;  %s1755_s27 = smov 32   ;;  %vm436_vm1 = vcmask 138240   ;;  %vm627_vm2 = vcmask 15360  }
  0x39   : > { %v459_v4 = vunpack.c.0.s8 %v458_v3  ;;  %v360_v14 = vld [vmem:[%s2132_s3] sm:$0xff]  ;;  %395 = vmatprep.subr.bf16.mxu0 %v1930_v10  ;;  %s1756_s20 = smov 34   ;;  %s1757_s28 = smov 17   ;;  %vm866_vm3 = vcmask 146432   ;;  %vm950_vm4 = vcmask 261120   ;;  %vm1103_vm5 = vcmask 277504  }
  0x3a   : > { %364 = vperm.xlu0 %1637, %v360_v14   ;;  %v1513_v16 = vld.sshfl [vmem:[%s2130_s1] sm:$0x11 pattern:$0x75316420]  ;;  %396 = vmatpush1.bf16.msra.mxu0 %v1932_v12  ;;  %v476_v18 = vsub.s32 0, %v461_v5  ;;  %s1758_s14 = smov 111  }
  0x3b   : > { %v462_v9 = vsub.s32 %v459_v4, %v461_v5  ;;  %v456_v25 = vcombine.high %v1513_v16, %v1513_v16  ;;  %s1759_s16 = smov 127   ;;  %v1641_v59 = vld [vmem:[%s2133_s4] sm:$0xff]   ;;  %s1760_s29 = smov 126   ;;  %vm505_vm6 = vcmask 1039360   ;;  %vm652_vm7 = vcmask 1031168  }
  0x3c   : > { %s1761_s24 = smov 112   ;;  %vm807_vm8 = vcmask 908288   ;;  %vm738_vm9 = vcmask 916480   ;;  %vm891_vm10 = vcmask 900096   ;;  %vm1044_vm11 = vcmask 777216   ;;  %s1416_s23 = scalar_lea.sflag [#allocation4], %s1916_s11 }
  0x3d   : > { %v463_v17 = vrot.slane %v1513_v16, %v462_v9  ;;  %1512 = vmatmul.mubr.msk.bf16.vlgmr.msra.gmra.mxu0 %vm377_vm0, %v1639_v13  ;;  %v470_v28 = vrot.slane %v456_v25, %v462_v9  ;;  %v1205_v25 = vld [vmem:[%s2136_s7] sm:$0xff]  ;;  %vm975_vm12 = vcmask 785408   ;;  %vm1128_vm13 = vcmask 769024   ;;  %p2150_p12 = scmp.ne.s32.totalorder %s2146_s21, 0 }
  0x3e   : > { %369 = vperm.xlu0 %1637, %v361_v15   ;;  %596 = vmatprep.mubr.bf16.mxu0 %v1750_v1 }
  0x3f   : > { %v607_v19 = vshrl.u32 %v463_v17, 16  ;;  %v472_v21 = vpack.i.b16 %v463_v17, %v463_v17  ;;  %v614_v34 = vshrl.u32 %v470_v28, 16  ;;  %v479_v45 = vpack.i.b16 %v470_v28, %v470_v28  ;;  %v1206_v28 = vld [vmem:[%s2136_s7 + $0x8] sm:$0xff] }
  0x41   : > { %v608_v20 = vpack.i.b16 %v607_v19, %v607_v19  ;;  %v477_v23 = vrot.slane %v472_v21, %v476_v18  ;;  %v615_v42 = vpack.i.b16 %v614_v34, %v614_v34  ;;  %v484_v46 = vrot.slane %v479_v45, %v476_v18 }
  0x43   : > { %v613_v22 = vrot.slane %v608_v20, %v476_v18  ;;  %v620_v44 = vrot.slane %v615_v42, %v476_v18 }
  0x45   : > { %623 = vrot.lane.b32.xlu0 %v613_v22, %s1752_s18 }
  0x49   : > { %709 = vrot.lane.b32.xlu0 %v477_v23, %s1753_s26 }
  0x4d   : > { %862 = vrot.lane.b32.xlu0 %v613_v22, %s1754_s19 }
  0x51   : > { %946 = vrot.lane.b32.xlu0 %v477_v23, %s1755_s27 }
  0x55   : > { %1099 = vrot.lane.b32.xlu0 %v613_v22, %s1756_s20 }
  0xb5   : > { %v365_v24 = vpop.permute.xlu0 %364 }
  0xb9   : > { %v370_v30 = vpop.permute.xlu0 %369 }
  0xbd   : > { %v624_v48 = vpop.permute.xlu0 %623 }
  0xc1   : > { %v710_v54 = vpop.permute.xlu0 %709 }
  0xc5   : > { %v863_v60 = vpop.permute.xlu0 %862 }
  0xc9   : > { %v947_v2 = vpop.permute.xlu0 %946 }
  0xcd   : > { %v1100_v18 = vpop.permute.xlu0 %1099 }
  0xfd   : > { %v415_v26 = vpop.f32.mrf.mxu0 }
  0xfe   : > { %v416_v29 = vadd.f32 %v415_v26, %v365_v24  ;;  %v1184_v26 = vld [vmem:[%s2134_s5 + $0x8] sm:$0xff] }
  0xff   : > { %v417_v27 = vpop.f32.mrf.mxu0 }
 0x100   : > { %v424_v35 = vmax.f32 %v416_v29, 0.0  ;;  %v418_v36 = vadd.f32 %v417_v27, %v365_v24  ;;  %v1183_v24 = vld [vmem:[%s2134_s5] sm:$0xff]  ;;  %v1207_v27 = vld [vmem:[%s2136_s7 + $0x10] sm:$0xff]  ;;  %v1208_v29 = vld [vmem:[%s2136_s7 + $0x18] sm:$0xff] }
 0x101   : > { %v419_v31 = vpop.f32.mrf.mxu0 }
 0x102   : > { %v420_v32 = vadd.f32 %v419_v31, %v370_v30  ;;  %v425_v41 = vmax.f32 %v418_v36, 0.0  ;;  %v1640_v36 = vld [vmem:[%s2133_s4 + $0x8] sm:$0xff]  }
 0x103   : > { %v421_v33 = vpop.f32.mrf.mxu0 }
 0x104   : > { %v426_v37 = vmax.f32 %v420_v32, 0.0  ;;  %v422_v38 = vadd.f32 %v421_v33, %v370_v30 }
 0x106   : > { %v427_v39 = vmax.f32 %v422_v38, 0.0  ;;  %v428_v40 = vpack.c.bf16 %v426_v37, %v424_v35 }
 0x108   : > { %432 = vrot.lane.b32.xlu1 %v428_v40, %s1757_s28  ;;  %v429_v43 = vpack.c.bf16 %v427_v39, %v425_v41 }
 0x10c   : > { %434 = vrot.lane.b32.xlu1 %v429_v43, %s1757_s28  ;;  %s1570_s28 = sshll.u32 %s1840_s13, 9  ;;  %s1766_s13 = smov [#allocation5]  }
 0x10d   : > { %s2086_s17 = scalar_lea.hbm %s2138_s9, %s1570_s28 }
 0x110   : > { %625 = vrot.lane.b32.xlu1 %v620_v44, %s1752_s18  ;;  %s1762_s18 = smov 110  }
 0x114   : > { %711 = vrot.lane.b32.xlu1 %v484_v46, %s1753_s26  ;;  %s1763_s26 = smov 96  }
 0x118   : > { %864 = vrot.lane.b32.xlu1 %v620_v44, %s1754_s19  ;;  %s1764_s19 = smov 95  }
 0x11c   : > { %948 = vrot.lane.b32.xlu1 %v484_v46, %s1755_s27  ;;  %s1765_s27 = smov 94  }
 0x120   : > { %1101 = vrot.lane.b32.xlu1 %v620_v44, %s1756_s20  ;;  %s350_s20 = scalar_lea.vmem [#allocation5], %s1509_s25 }
 0x121   : > { %s1429_s25 = sshll.u32 %s350_s20, 4  ;;  %s2081_s25 = int_to_ptr.vmem [resolvable:$true] %s1429_s25 }
 0x17a   : > { %v433_v47 = vpop.permute.xlu1 %432 }
 0x17b   : > { %v1960_v49 = vsel %vm436_vm1, 0, %v433_v47 }
 0x17c   : > { %801 = vrot.lane.b32.xlu1 %v1960_v49, %s1758_s14  ;;  %499 = vrot.lane.b32.xlu0 %v1960_v49, %s1759_s16  ;;  %v485_v55 = vmul.bf16 %v477_v23, %v1960_v49  ;;  %v632_v57 = vmul.bf16 %v624_v48, %v1960_v49  ;;  %v718_v58 = vmul.bf16 %v710_v54, %v1960_v49 }
 0x17d   : > { %v871_v0 = vmul.bf16 %v863_v60, %v1960_v49  ;;  %v955_v5 = vmul.bf16 %v947_v2, %v1960_v49  ;;  %v1108_v22 = vmul.bf16 %v1100_v18, %v1960_v49 }
 0x17e   : > { %v435_v50 = vpop.permute.xlu1 %434 }
 0x17f   : > { %v1964_v51 = vsel %vm436_vm1, %v433_v47, %v435_v50  ;;  %v1966_v52 = vsel %vm436_vm1, %v435_v50, 0  ;;  %v1642_v47 = vld [vmem:[%s2133_s4 + $0x10] sm:$0xff]  }
 0x180   : > { %503 = vrot.lane.b32.xlu1 %v1966_v52, %s1759_s16  ;;  %501 = vrot.lane.b32.xlu0 %v1964_v51, %s1759_s16  ;;  %v486_v53 = vmul.bf16 %v484_v46, %v1964_v51 }
 0x182   : > { %578 = vmatprep.subr.bf16.mxu0 %v486_v53  ;;  %v626_v56 = vpop.permute.xlu1 %625 }
 0x183   : > { %579 = vmatpush1.bf16.msra.mxu0 %v485_v55  ;;  %v628_v61 = vsel %vm627_vm2, %v624_v48, %v626_v56  ;;  %v634_v3 = vmul.bf16 %v626_v56, %v1966_v52 }
 0x184   : > { %646 = vrot.lane.b32.xlu1 %v632_v57, %s1760_s29  ;;  %732 = vrot.lane.b32.xlu0 %v718_v58, %s1761_s24  ;;  %v633_v63 = vmul.bf16 %v628_v61, %v1964_v51  ;;  %v1644_v57 = vld [vmem:[%s2133_s4 + $0x20] sm:$0xff]  }
 0x186   : > { %1519 = vmatmul.mubr.msk.bf16.vlgmr.msra.gmra.mxu0 %vm377_vm0, %v1641_v59  ;;  %v712_v62 = vpop.permute.xlu1 %711 }
 0x187   : > { %778 = vmatprep.mubr.bf16.mxu0 %v1750_v1  ;;  %v714_v6 = vsel %vm377_vm0, %v710_v54, %v712_v62  ;;  %v720_v8 = vmul.bf16 %v712_v62, %v1966_v52  ;;  %v1643_v54 = vld [vmem:[%s2133_s4 + $0x18] sm:$0xff]   ;;  %v1645_v62 = vld [vmem:[%s2133_s4 + $0x28] sm:$0xff]  }
 0x188   : > { %803 = vrot.lane.b32.xlu1 %v1964_v51, %s1758_s14  ;;  %805 = vrot.lane.b32.xlu0 %v1966_v52, %s1758_s14  ;;  %v719_v7 = vmul.bf16 %v714_v6, %v1964_v51 }
 0x18a   : > { %v865_v4 = vpop.permute.xlu1 %864 }
 0x18b   : > { %v873_v11 = vmul.bf16 %v865_v4, %v1966_v52  ;;  %v867_v13 = vsel %vm866_vm3, %v863_v60, %v865_v4 }
 0x18c   : > { %885 = vrot.lane.b32.xlu0 %v871_v0, %s1762_s18  ;;  %648 = vrot.lane.b32.xlu1 %v633_v63, %s1760_s29  ;;  %v872_v15 = vmul.bf16 %v867_v13, %v1964_v51 }
 0x18e   : > { %v949_v9 = vpop.permute.xlu1 %948 }
 0x18f   : > { %v951_v14 = vsel %vm950_vm4, %v947_v2, %v949_v9  ;;  %v957_v19 = vmul.bf16 %v949_v9, %v1966_v52  ;;  %v1647_v9 = vld [vmem:[%s2133_s4 + $0x38] sm:$0xff]  }
 0x190   : > { %650 = vrot.lane.b32.xlu0 %v634_v3, %s1760_s29  ;;  %969 = vrot.lane.b32.xlu1 %v955_v5, %s1763_s26  ;;  %v956_v16 = vmul.bf16 %v951_v14, %v1964_v51  ;;  %v1646_v5 = vld [vmem:[%s2133_s4 + $0x30] sm:$0xff]   ;;  %s1681_s29 = scalar_lea.vmem %s2081_s25, 512 }
 0x191   : > { %p1682_p11 = scmp.ne.s32.totalorder %s2081_s25, %s1681_s29 }
 0x192   : > { %v1102_v17 = vpop.permute.xlu1 %1101 }
 0x193   : > { %v1104_v20 = vsel %vm1103_vm5, %v1100_v18, %v1102_v17  ;;  %v1110_v23 = vmul.bf16 %v1102_v17, %v1966_v52  ;;  %v1650_v17 = vld [vmem:[%s2137_s8] sm:$0xff]   ;;  %v1652_v18 = vld [vmem:[%s2137_s8 + $0x8] sm:$0xff]   ;;  %p1683_p13 = pnand %p1682_p11, %p2150_p12 }
 0x194   : > { %736 = vrot.lane.b32.xlu1 %v720_v8, %s1761_s24  ;;  %734 = vrot.lane.b32.xlu0 %v719_v7, %s1761_s24  ;;  %v1109_v21 = vmul.bf16 %v1104_v20, %v1964_v51  ;;  %s1685_s24 = sshll.u32 %s1766_s13, 4  ;;  %s1686_s24 = int_to_ptr.vmem [resolvable:$false] %s1685_s24 }
 0x195   : > { %p1684_p4 = pneg %p1683_p13  ;;  %p1688_p5 = scmp.lt.s32.totalorder %s2081_s25, %s1686_s24 }
 0x198   : > { %1040 = vrot.lane.b32.xlu0 %v1964_v51, %s1764_s19  ;;  %889 = vrot.lane.b32.xlu1 %v873_v11, %s1762_s18 }
 0x19c   : > { %887 = vrot.lane.b32.xlu0 %v872_v15, %s1762_s18  ;;  %971 = vrot.lane.b32.xlu1 %v956_v16, %s1763_s26  ;;  %v1648_v16 = vld [vmem:[%s2133_s4 + $0x40] sm:$0xff]   ;;  %s1687_s18 = scalar_lea.vmem %s1686_s24, 1024 }
 0x19d   : > { %p1689_p7 = scmp.lt.s32.totalorder %s1687_s18, %s1681_s29 }
 0x19f   : > { %p1690_p8 = por %p1689_p7, %p1688_p5 }
 0x1a0   : > { %973 = vrot.lane.b32.xlu0 %v957_v19, %s1763_s26  ;;  %1042 = vrot.lane.b32.xlu1 %v1966_v52, %s1764_s19 }
 0x1a1   : > { %p1691_p10 = pnand %p1690_p8, %p1684_p4 }
 0x1a4   : > { %1038 = vrot.lane.b32.xlu0 %v1960_v49, %s1764_s19  ;;  %1124 = vrot.lane.b32.xlu1 %v1109_v21, %s1765_s27 }
 0x1a8   : > { %1126 = vrot.lane.b32.xlu0 %v1110_v23, %s1765_s27  ;;  %1122 = vrot.lane.b32.xlu1 %v1108_v22, %s1765_s27 }
 0x1ac   : > { %1187 = vperm.xlu0 %1637, %v1183_v24   ;;  %1192 = vperm.xlu1 %1638, %v1184_v26  }
 0x1b0   : > { %1211 = vperm.xlu0 %1637, %v1205_v25   ;;  %1216 = vperm.xlu1 %1638, %v1206_v28  }
 0x1b4   : > { %1221 = vperm.xlu0 %1637, %v1207_v27   ;;  %1226 = vperm.xlu1 %1638, %v1208_v29  }
 0x1ee   : > { %v500_v30 = vpop.permute.xlu0 %499  ;;  %v802_v31 = vpop.permute.xlu1 %801 }
 0x1f2   : > { %v502_v32 = vpop.permute.xlu0 %501  ;;  %v504_v33 = vpop.permute.xlu1 %503 }
 0x1f3   : > { %v507_v34 = vsel %vm505_vm6, %v502_v32, %v504_v33  ;;  %v506_v35 = vsel %vm505_vm6, %v500_v30, %v502_v32 }
 0x1f4   : > { %527 = vmatprep.subr.bf16.mxu1 %v507_v34 }
 0x1f5   : > { %528 = vmatpush1.bf16.msra.mxu1 %v506_v35 }
 0x1f6   : > { %v733_v37 = vpop.permute.xlu0 %732  ;;  %v647_v38 = vpop.permute.xlu1 %646 }
 0x1f8   : > { %1517 = vmatmul.mubr.msk.bf16.vlgmr.msra.gmra.mxu1 %vm377_vm0, %v1640_v36 }
 0x1f9   : > { %692 = vmatprep.mubr.bf16.mxu1 %v1750_v1 }
 0x1fa   : > { %v806_v39 = vpop.permute.xlu0 %805  ;;  %v804_v40 = vpop.permute.xlu1 %803 }
 0x1fb   : > { %v809_v48 = vsel %vm807_vm8, %v804_v40, %v806_v39  ;;  %v808_v53 = vsel %vm807_vm8, %v802_v31, %v804_v40 }
 0x1fe   : > { %v886_v41 = vpop.permute.xlu0 %885  ;;  %v649_v42 = vpop.permute.xlu1 %648 }
 0x1ff   : > { %v653_v46 = vsel %vm652_vm7, %v647_v38, %v649_v42 }
 0x202   : > { %v651_v43 = vpop.permute.xlu0 %650  ;;  %v970_v44 = vpop.permute.xlu1 %969 }
 0x203   : > { %v654_v45 = vsel %vm652_vm7, %v649_v42, %v651_v43 }
 0x204   : > { %674 = vmatprep.subr.bf16.mxu1 %v654_v45 }
 0x205   : > { %675 = vmatpush1.bf16.msra.mxu1 %v653_v46 }
 0x206   : > { %v735_v49 = vpop.permute.xlu0 %734  ;;  %829 = vmatprep.subr.bf16.mxu1 %v809_v48  ;;  %v737_v50 = vpop.permute.xlu1 %736 }
 0x207   : > { %v739_v51 = vsel %vm738_vm9, %v733_v37, %v735_v49  ;;  %v740_v52 = vsel %vm738_vm9, %v735_v49, %v737_v50 }
 0x208   : > { %1523 = vmatmul.mubr.msk.bf16.vlgmr.msra.gmra.mxu1 %vm377_vm0, %v1642_v47  ;;  %760 = vmatprep.subr.bf16.mxu0 %v740_v52 }
 0x209   : > { %761 = vmatpush1.bf16.msra.mxu0 %v739_v51  ;;  %830 = vmatpush1.bf16.msra.mxu1 %v808_v53 }
 0x20a   : > { %v1041_v55 = vpop.permute.xlu0 %1040  ;;  %v890_v56 = vpop.permute.xlu1 %889  ;;  %847 = vmatprep.mubr.bf16.mxu1 %v1750_v1 }
 0x20c   : > { %1527 = vmatmul.mubr.msk.bf16.vlgmr.msra.gmra.mxu0 %vm377_vm0, %v1643_v54 }
 0x20d   : > { %931 = vmatprep.mubr.bf16.mxu0 %v1750_v1 }
 0x20e   : > { %v888_v58 = vpop.permute.xlu0 %887  ;;  %v972_v59 = vpop.permute.xlu1 %971 }
 0x20f   : > { %v892_v60 = vsel %vm891_vm10, %v886_v41, %v888_v58  ;;  %v893_v61 = vsel %vm891_vm10, %v888_v58, %v890_v56  ;;  %v976_v4 = vsel %vm975_vm12, %v970_v44, %v972_v59 }
 0x210   : > { %1531 = vmatmul.mubr.msk.bf16.vlgmr.msra.gmra.mxu1 %vm377_vm0, %v1644_v57  ;;  %913 = vmatprep.subr.bf16.mxu0 %v893_v61 }
 0x211   : > { %914 = vmatpush1.bf16.msra.mxu0 %v892_v60  ;;  %1015 = vmatprep.mubr.bf16.mxu1 %v1750_v1 }
 0x212   : > { %v974_v63 = vpop.permute.xlu0 %973  ;;  %v1043_v0 = vpop.permute.xlu1 %1042 }
 0x213   : > { %v977_v2 = vsel %vm975_vm12, %v972_v59, %v974_v63  ;;  %v1046_v3 = vsel %vm1044_vm11, %v1041_v55, %v1043_v0 }
 0x214   : > { %1535 = vmatmul.mubr.msk.bf16.vlgmr.msra.gmra.mxu0 %vm377_vm0, %v1645_v62  ;;  %997 = vmatprep.subr.bf16.mxu1 %v977_v2 }
 0x215   : > { %1066 = vmatprep.subr.bf16.mxu0 %v1046_v3  ;;  %998 = vmatpush1.bf16.msra.mxu1 %v976_v4 }
 0x216   : > { %v1039_v6 = vpop.permute.xlu0 %1038  ;;  %v1125_v7 = vpop.permute.xlu1 %1124  ;;  %1084 = vmatprep.mubr.bf16.mxu0 %v1750_v1 }
 0x217   : > { %v1045_v8 = vsel %vm1044_vm11, %v1039_v6, %v1041_v55 }
 0x218   : > { %1539 = vmatmul.mubr.msk.bf16.vlgmr.msra.gmra.mxu1 %vm377_vm0, %v1646_v5  ;;  %1067 = vmatpush1.bf16.msra.mxu0 %v1045_v8 }
 0x219   : > { %1168 = vmatprep.mubr.bf16.mxu1 %v1750_v1 }
 0x21a   : > { %v1127_v11 = vpop.permute.xlu0 %1126  ;;  %v1123_v13 = vpop.permute.xlu1 %1122 }
 0x21b   : > { %v1129_v14 = vsel %vm1128_vm13, %v1123_v13, %v1125_v7  ;;  %v1130_v15 = vsel %vm1128_vm13, %v1125_v7, %v1127_v11 }
 0x21c   : > { %1543 = vmatmul.mubr.msk.bf16.vlgmr.msra.gmra.mxu0 %vm377_vm0, %v1647_v9  ;;  %1150 = vmatprep.subr.bf16.mxu1 %v1130_v15 }
 0x21d   : > { %1151 = vmatpush1.bf16.msra.mxu1 %v1129_v14  ;;  %1277 = vmatprep.mubr.bf16.mxu0 %v1750_v1 }
 0x21e   : > { %1332 = vmatprep.subr.bf16.mxu1 %v1930_v10 }
 0x220   : > { %1547 = vmatmul.mubr.msk.bf16.vlgmr.msra.gmra.mxu1 %vm377_vm0, %v1648_v16 }
 0x221   : > { %1333 = vmatpush1.bf16.msra.mxu1 %v1932_v12  ;;  %1350 = vmatprep.mubr.bf16.mxu1 %v1750_v1 }
 0x228   : > { %1554 = vmatmul.mubr.msk.bf16.vlgmr.msra.gmra.mxu1 %vm377_vm0, %v1650_v17 }
 0x229   : > { %1360 = vmatprep.mubr.bf16.mxu1 %v1750_v1 }
 0x230   : > { %1555 = vmatmul.mubr.msk.bf16.gmra.mxu1 %vm377_vm0, %v1652_v18 }
 0x246   : > { %v598_v19 = vpop.f32.mrf.mxu0 }
 0x248   : > { %v600_v12 = vpop.f32.mrf.mxu0 }
 0x24a   : > { %v602_v22 = vpop.f32.mrf.mxu0 }
 0x24c   : > { %v604_v25 = vpop.f32.mrf.mxu0 }
 0x2b8   : > { %v547_v10 = vpop.f32.mrf.mxu1 }
 0x2b9   : > { %v599_v41 = vadd.f32 %v598_v19, %v547_v10 }
 0x2ba   : > { %v549_v20 = vpop.f32.mrf.mxu1 }
 0x2bb   : > { %v601_v39 = vadd.f32 %v600_v12, %v549_v20 }
 0x2bc   : > { %v551_v21 = vpop.f32.mrf.mxu1 }
 0x2bd   : > { %v603_v40 = vadd.f32 %v602_v22, %v551_v21  ;;  %v1193_v21 = vpop.permute.xlu1 %1192 }
 0x2be   : > { %v553_v23 = vpop.f32.mrf.mxu1 }
 0x2bf   : > { %v605_v44 = vadd.f32 %v604_v25, %v553_v23  ;;  %v1188_v23 = vpop.permute.xlu0 %1187 }
 0x2c8   : > { %v694_v24 = vpop.f32.mrf.mxu1 }
 0x2c9   : > { %v703_v47 = vadd.f32 %v694_v24, %v599_v41 }
 0x2ca   : > { %v696_v26 = vpop.f32.mrf.mxu1 }
 0x2cb   : > { %v704_v45 = vadd.f32 %v696_v26, %v601_v39 }
 0x2cc   : > { %v698_v27 = vpop.f32.mrf.mxu1  ;;  %v780_v28 = vpop.f32.mrf.mxu0 }
 0x2cd   : > { %v705_v46 = vadd.f32 %v698_v27, %v603_v40  ;;  %v789_v53 = vadd.f32 %v780_v28, %v703_v47  ;;  %v1217_v40 = vpop.permute.xlu1 %1216 }
 0x2ce   : > { %v700_v29 = vpop.f32.mrf.mxu1  ;;  %v782_v30 = vpop.f32.mrf.mxu0 }
 0x2cf   : > { %v706_v50 = vadd.f32 %v700_v29, %v605_v44  ;;  %v790_v51 = vadd.f32 %v782_v30, %v704_v45  ;;  %v1649_v30 = vld [vmem:[%s2135_s6] sm:$0xff]  }
 0x2d0   : > { %v784_v31 = vpop.f32.mrf.mxu0  ;;  %v849_v32 = vpop.f32.mrf.mxu1 }
 0x2d1   : > { %v791_v52 = vadd.f32 %v784_v31, %v705_v46  ;;  %v858_v59 = vadd.f32 %v849_v32, %v789_v53  ;;  %v1651_v31 = vld [vmem:[%s2135_s6 + $0x8] sm:$0xff]  }
 0x2d2   : > { %v786_v33 = vpop.f32.mrf.mxu0  ;;  %v851_v34 = vpop.f32.mrf.mxu1 }
 0x2d3   : > { %v792_v56 = vadd.f32 %v786_v33, %v706_v50  ;;  %v859_v57 = vadd.f32 %v851_v34, %v790_v51 }
 0x2d4   : > { %v853_v35 = vpop.f32.mrf.mxu1  ;;  %v933_v36 = vpop.f32.mrf.mxu0 }
 0x2d5   : > { %v860_v58 = vadd.f32 %v853_v35, %v791_v52  ;;  %v942_v2 = vadd.f32 %v933_v36, %v858_v59  ;;  %v1212_v35 = vpop.permute.xlu0 %1211 }
 0x2d6   : > { %v855_v37 = vpop.f32.mrf.mxu1  ;;  %v935_v38 = vpop.f32.mrf.mxu0 }
 0x2d7   : > { %v861_v62 = vadd.f32 %v855_v37, %v792_v56  ;;  %v943_v63 = vadd.f32 %v935_v38, %v859_v57 }
 0x2d8   : > { %v937_v42 = vpop.f32.mrf.mxu0  ;;  %v1017_v43 = vpop.f32.mrf.mxu1 }
 0x2d9   : > { %v944_v0 = vadd.f32 %v937_v42, %v860_v58  ;;  %v1026_v8 = vadd.f32 %v1017_v43, %v942_v2  ;;  %v1222_v47 = vpop.permute.xlu0 %1221  ;;  %v1227_v58 = vpop.permute.xlu1 %1226 }
 0x2da   : > { %v939_v48 = vpop.f32.mrf.mxu0  ;;  %v1019_v49 = vpop.f32.mrf.mxu1 }
 0x2db   : > { %v945_v5 = vadd.f32 %v939_v48, %v861_v62  ;;  %v1027_v6 = vadd.f32 %v1019_v49, %v943_v63 }
 0x2dc   : > { %v1021_v54 = vpop.f32.mrf.mxu1  ;;  %v1086_v55 = vpop.f32.mrf.mxu0 }
 0x2dd   : > { %v1028_v7 = vadd.f32 %v1021_v54, %v944_v0  ;;  %v1095_v16 = vadd.f32 %v1086_v55, %v1026_v8 }
 0x2de   : > { %v1023_v60 = vpop.f32.mrf.mxu1  ;;  %v1088_v61 = vpop.f32.mrf.mxu0 }
 0x2df   : > { %v1029_v13 = vadd.f32 %v1023_v60, %v945_v5  ;;  %v1096_v14 = vadd.f32 %v1088_v61, %v1027_v6 }
 0x2e0   : > { %v1090_v3 = vpop.f32.mrf.mxu0  ;;  %v1170_v4 = vpop.f32.mrf.mxu1 }
 0x2e1   : > { %v1097_v15 = vadd.f32 %v1090_v3, %v1028_v7  ;;  %v1179_v20 = vadd.f32 %v1170_v4, %v1095_v16 }
 0x2e2   : > { %v1092_v9 = vpop.f32.mrf.mxu0  ;;  %v1172_v11 = vpop.f32.mrf.mxu1 }
 0x2e3   : > { %v1098_v18 = vadd.f32 %v1092_v9, %v1029_v13  ;;  %v1180_v10 = vadd.f32 %v1172_v11, %v1096_v14  ;;  %v1195_v27 = vadd.f32 %v1188_v23, %v1179_v20 }
 0x2e4   : > { %v1174_v17 = vpop.f32.mrf.mxu1 }
 0x2e5   : > { %v1181_v19 = vadd.f32 %v1174_v17, %v1097_v15  ;;  %v1196_v25 = vadd.f32 %v1188_v23, %v1180_v10 }
 0x2e6   : > { %v1176_v12 = vpop.f32.mrf.mxu1 }
 0x2e7   : > { %v1182_v22 = vadd.f32 %v1176_v12, %v1098_v18  ;;  %v1197_v24 = vadd.f32 %v1193_v21, %v1181_v19 }
 0x2e8   : > { %v1352_v32 = vpop.f32.mrf.mxu1 }
 0x2e9   : > { %v1198_v26 = vadd.f32 %v1193_v21, %v1182_v22  ;;  %v1199_v29 = vpack.c.bf16 %v1197_v24, %v1195_v27 }
 0x2ea   : > { %v1354_v33 = vpop.f32.mrf.mxu1 }
 0x2eb   : > { %v1200_v28 = vpack.c.bf16 %v1198_v26, %v1196_v25 }
 0x2ec   : > { %v1356_v34 = vpop.f32.mrf.mxu1 }
 0x2ed   : > { %1259 = vmatprep.subr.bf16.mxu0 %v1200_v28 }
 0x2ee   : > { %1260 = vmatpush1.bf16.msra.mxu0 %v1199_v29  ;;  %v1358_v37 = vpop.f32.mrf.mxu1 }
 0x2f0   : > { %v1362_v44 = vpop.f32.mrf.mxu1 }
 0x2f1   : > { %1550 = vmatmul.mubr.msk.bf16.vlgmr.msra.gmra.mxu0 %vm377_vm0, %v1649_v30 }
 0x2f2   : > { %1287 = vmatprep.mubr.bf16.mxu0 %v1750_v1  ;;  %v1364_v53 = vpop.f32.mrf.mxu1 }
 0x2f4   : > { %v1366_v0 = vpop.f32.mrf.mxu1 }
 0x2f6   : > { %v1368_v11 = vpop.f32.mrf.mxu1 }
 0x2f9   : > { %1551 = vmatmul.mubr.msk.bf16.gmra.mxu0 %vm377_vm0, %v1651_v31 }
 0x3b1   : > { %v1279_v36 = vpop.f32.mrf.mxu0 }
 0x3b2   : > { %v1280_v38 = vadd.f32 %v1279_v36, %v1212_v35 }
 0x3b3   : > { %v1281_v39 = vpop.f32.mrf.mxu0 }
 0x3b4   : > { %v1371_v41 = vadd.f32 %v1352_v32, %v1280_v38  ;;  %v1282_v42 = vadd.f32 %v1281_v39, %v1212_v35 }
 0x3b5   : > { %v1283_v43 = vpop.f32.mrf.mxu0 }
 0x3b6   : > { %v1372_v1 = vadd.f32 %v1354_v33, %v1282_v42  ;;  %v1284_v45 = vadd.f32 %v1283_v43, %v1217_v40  ;;  %v1379_v48 = vmax.f32 %v1371_v41, 0.0 }
 0x3b7   : > { %v1285_v46 = vpop.f32.mrf.mxu0 }
 0x3b8   : > { %v1380_v49 = vmax.f32 %v1372_v1, 0.0  ;;  %v1373_v50 = vadd.f32 %v1356_v34, %v1284_v45  ;;  %v1286_v51 = vadd.f32 %v1285_v46, %v1217_v40 }
 0x3b9   : > { %v1289_v52 = vpop.f32.mrf.mxu0 }
 0x3ba   : > { %v1566_v54 = vpack.c.bf16 %v1380_v49, %v1379_v48  ;;  %v1374_v55 = vadd.f32 %v1358_v37, %v1286_v51  ;;  %v1290_v56 = vadd.f32 %v1289_v52, %v1222_v47  ;;  %v1381_v59 = vmax.f32 %v1373_v50, 0.0 }
 0x3bb   : > { %v1291_v57 = vpop.f32.mrf.mxu0 }
 0x3bc   : > { %1411 = vst [vmem:[%s350_s20] sm:$0xff] %v1566_v54  ;;  %v1382_v60 = vmax.f32 %v1374_v55, 0.0  ;;  %v1375_v61 = vadd.f32 %v1362_v44, %v1290_v56  ;;  %v1292_v62 = vadd.f32 %v1291_v57, %v1222_v47 }
 0x3bd   : > { %v1293_v63 = vpop.f32.mrf.mxu0 }
 0x3be   : > { %v1567_v2 = vpack.c.bf16 %v1382_v60, %v1381_v59  ;;  %v1376_v3 = vadd.f32 %v1364_v53, %v1292_v62  ;;  %v1294_v4 = vadd.f32 %v1293_v63, %v1227_v58  ;;  %v1383_v6 = vmax.f32 %v1375_v61, 0.0 }
 0x3bf   : > { %v1295_v5 = vpop.f32.mrf.mxu0 }
 0x3c0   : > { %1412 = vst [vmem:[%s350_s20 + $0x8] sm:$0xff] %v1567_v2  ;;  %v1384_v7 = vmax.f32 %v1376_v3, 0.0  ;;  %v1377_v8 = vadd.f32 %v1366_v0, %v1294_v4  ;;  %v1296_v9 = vadd.f32 %v1295_v5, %v1227_v58 }
 0x3c2   : > { %v1568_v13 = vpack.c.bf16 %v1384_v7, %v1383_v6  ;;  %v1378_v14 = vadd.f32 %v1368_v11, %v1296_v9  ;;  %v1385_v15 = vmax.f32 %v1377_v8, 0.0 }
 0x3c4   : > { %1413 = vst [vmem:[%s350_s20 + $0x10] sm:$0xff] %v1568_v13  ;;  %v1386_v16 = vmax.f32 %v1378_v14, 0.0 }
 0x3c6   : > { %v1569_v17 = vpack.c.bf16 %v1386_v16, %v1385_v15 }
 0x3c8   : > { %1414 = vst [vmem:[%s350_s20 + $0x18] sm:$0xff] %v1569_v17 }
 0x3c9   : > { %1694 = shalt.err (!%p1691_p10)
}
 0x3ca   : > { %s1695_s26 = scalar_lea.hbm %s2086_s17, 512  ;;  %s1699_s20 = scalar_lea.hbm %s2138_s9, 1024 }
 0x3cb   : > { %p1696_p0 = scmp.ne.s32.totalorder %s2086_s17, %s1695_s26  ;;  %p1700_p1 = scmp.lt.s32.totalorder %s2086_s17, %s2138_s9 }
 0x3cc   : > { %p1701_p3 = scmp.lt.s32.totalorder %s1699_s20, %s1695_s26 }
 0x3cd   : > { %p1697_p2 = pnand %p1696_p0, %p2150_p12 }
 0x3ce   : > { %p1702_p6 = por %p1701_p3, %p1700_p1 }
 0x3cf   : > { %p1698_p9 = pneg %p1697_p2 }
 0x3d1   : > { %p1703_p11 = pnand %p1702_p6, %p1698_p9 }
 0x3d3   : > { %1706 = shalt.err (!%p1703_p11)
}
 0x3d4   : > { %s1767_s16 = smov 128   ;;  %s1768_s29 = smov 8  }
 0x3d5   : > { %1573 = dma.vmem_to_hbm [thread:$0]  (%p2150_p12), %s2081_s25, 512, %s2086_s17, %s1416_s23, %s1767_s16, %s1767_s16, %s1768_s29  }
 0x3d6 PF: > { %s1444_s13 = sand.u32 1, %s1733_s30   ;;  %p2151_p13 = scmp.ne.s32.totalorder %s2147_s22, 0 }
 0x3d7   : > { %p2152_p4 = scmp.ge.s32.totalorder %s1745_s12, 2  ;;  %s1445_s24 = scalar_lea.sflag [#allocation4], %s1444_s13 }
 0x3d9   : > { %p1580_p5 = pnand %p2152_p4, %p2151_p13 }
 0x3db   : > { %p1581_p7 = pneg %p1580_p5 }
 0x3dd   : > { %1728 = dma.done.wait (%p1581_p7), %s1445_s24, 512  }
 0x3de   : > { %1730 = vsyncadd (%p1581_p7), %s1445_s24, 4294966784  ;;  %s2153_s18 = sld [smem:[#allocation8_spill]]  ;;  %p22_p8 = scmp.ge.s32.totalorder %s1844_s15, 4  }
 0x3df   : > { %s2154_s11 = sld [smem:[#allocation9_spill]]  ;;  %s2155_s30 = smov %s1737_s10 }
 0x3e0   : > { %s2157_s12 = smov %s1844_s15  ;;  %24 = sbr.rel (!%p22_p8) target bundleno = 5 (0x5), region = 109 }
 0x3e4   : > { %s2156_s10 = smov %s2153_s18 }
 0x3e5   :  { %1450 = vsyncpa [#allocation3], 1 }
 0x3e6   :  { %1452 = vsyncpa [#allocation3 + $0x1], 1 }
 0x3e7   :  { %1453 = vsyncpa [#allocation4], 1 }
 0x3e8   :  { %1455 = vsyncpa [#allocation4 + $0x1], 1 }

</bundles_post_ra>
